<compile_context>
chip_gen: v6e
topology: v6e:2x2x1
jax: 0.10.0
libtpu: 0.0.40
codegen_flags: <defaults>
</compile_context>

<pallas_src>
import math

import jax
import jax.numpy as jnp
from jax.experimental import pallas as pl
from jax.experimental.pallas import tpu as pltpu


def _round_up(x, m):
    return ((x + m - 1) // m) * m


def _critic_kernel(state_ref, action_ref, w1s_ref, w1a_ref, b1_ref,
                   w2_ref, b2_ref, w3_ref, b3_ref, out_ref):
    # fc1: relu(cat([s,a]) @ W1 + b1) == relu(s @ W1_s + a @ W1_a + b1)
    s = state_ref[...].astype(jnp.bfloat16)              # [TB, S]
    a = action_ref[...].astype(jnp.bfloat16)             # [TB, A]
    h1 = (jnp.dot(s, w1s_ref[...], preferred_element_type=jnp.float32)
          + jnp.dot(a, w1a_ref[...], preferred_element_type=jnp.float32))
    h1 = jnp.maximum(h1 + b1_ref[...], 0.0)              # [TB, H] f32

    # fc2
    h2 = jnp.dot(h1.astype(jnp.bfloat16), w2_ref[...],
                 preferred_element_type=jnp.float32)
    h2 = jnp.maximum(h2 + b2_ref[...], 0.0)              # [TB, H] f32

    # fc3: lane-dense MXU matmul against a [H, 128] weight (only column 0 is
    # nonzero; bias padded identically).  Full-width (TB, 128) store keeps
    # the output lane-dense; the wrapper keeps column 0 only.
    q = jnp.dot(h2, w3_ref[...], preferred_element_type=jnp.float32)
    out_ref[...] = (q + b3_ref[...]).astype(out_ref.dtype)


def _vmem_limit_bytes(TB, S, A, H):
    """Working-set estimate (with headroom) for the scoped-VMEM limit."""
    f32, bf16 = 4, 2
    weights = (S + A + H) * H * bf16                       # w1_s, w1_a, w2
    weights += 2 * H * f32 + (H + 1) * 128 * f32           # b1, b2, w3, b3
    io = 2 * TB * (_round_up(S, 128) + _round_up(A, 128) + 128) * f32
    scratch = 3 * TB * H * f32                             # h1 / h2 f32 temps
    est = 2 * weights + io + scratch                       # weights may double-buffer
    return int(min(max(est + (2 << 20), 16 << 20), 40 << 20))


def _critic_pallas_call(state, action, params, TB, single_buffer_weights):
    w1_s, w1_a, b1, w2, b2, w3, b3 = params
    B, S = state.shape
    A = action.shape[1]
    H = w1_s.shape[1]

    batch_map = lambda i: (i, 0)
    const_map = lambda i: (0, 0)

    def wspec(shape):
        if single_buffer_weights:
            # Constant-indexed blocks are fetched once; one VMEM buffer
            # (instead of the default two) halves their resident footprint.
            return pl.BlockSpec(shape, const_map, pipeline_mode=pl.Buffered(1))
        return pl.BlockSpec(shape, const_map)

    in_specs = [
        pl.BlockSpec((TB, S), batch_map),     # state  (batch-tiled)
        pl.BlockSpec((TB, A), batch_map),     # action (batch-tiled)
        wspec((S, H)),                        # w1_s
        wspec((A, H)),                        # w1_a
        wspec((1, H)),                        # b1
        wspec((H, H)),                        # w2
        wspec((1, H)),                        # b2
        wspec((H, 128)),                      # w3  (column 0 only nonzero)
        wspec((1, 128)),                      # b3  (column 0 only nonzero)
    ]
    out_spec = pl.BlockSpec((TB, 128), batch_map)

    return pl.pallas_call(
        _critic_kernel,
        out_shape=jax.ShapeDtypeStruct((B, 128), jnp.float32),
        grid=(pl.cdiv(B, TB),),
        in_specs=in_specs,
        out_specs=out_spec,
        compiler_params=pltpu.CompilerParams(
            dimension_semantics=("parallel",),
            vmem_limit_bytes=_vmem_limit_bytes(TB, S, A, H)),
    )(state, action, w1_s, w1_a, b1, w2, b2, w3, b3)


def critic_forward(state, action, params):
    """Pallas forward pass. state: [B, S], action: [B, A] -> [B, 1] f32."""
    B = state.shape[0]
    # Batch tile: big tiles amortize the ~0.35us per-grid-step overhead.  For
    # B > 256, cap at 512 rows and size to ~ceil(B/2) so the "parallel" axis
    # has >= 2 steps (both v7x TensorCores get work) while bounding the f32
    # [TB, H] intermediates on v7x's 64 MiB VMEM.
    if B <= 256:
        TB = B
    else:
        TB = min(512, _round_up((B + 1) // 2, 8))

    try:
        q = _critic_pallas_call(state, action, params, TB,
                                single_buffer_weights=True)
    except Exception:
        # jax build without BlockSpec.pipeline_mode / pl.Buffered support:
        # fall back to default double-buffered weights (same math).
        q = _critic_pallas_call(state, action, params, TB,
                                single_buffer_weights=False)
    return q[:, :1]


def _hidden_pad_multiple():
    # v6e/v7x MXUs are 2x256^2 -> pad the hidden width to 256; v5e (4x128^2)
    # and older only need 128-lane alignment.
    try:
        kind = jax.devices()[0].device_kind.lower()
    except Exception:
        return 128
    return 256 if ("v6" in kind or "v7" in kind) else 128


def init_critic_params(key, state_dim, action_dim, hidden_dim,
                       pad_multiple=None):
    """Init mimicking nn.Linear's U(-1/sqrt(fan_in), +1/sqrt(fan_in)).

    fc1 is split into state/action halves; the hidden width is zero-padded to
    a lane/MXU-friendly multiple (padded rows/cols are zero, so the computed
    function is identical to the hidden_dim-wide network).  fc3's weight and
    bias are padded to 128 output lanes with only column 0 nonzero so the
    kernel's output block is lane-dense.  fc1/fc2 weights are stored bf16
    (MXU-native); biases and fc3 stay f32.
    """
    if pad_multiple is None:
        pad_multiple = _hidden_pad_multiple()
    hp = _round_up(hidden_dim, pad_multiple)

    def uniform(k, shape, fan_in):
        bound = 1.0 / math.sqrt(fan_in)
        return jax.random.uniform(k, shape, jnp.float32, -bound, bound)

    k1s, k1a, kb1, k2, kb2, k3, kb3 = jax.random.split(key, 7)
    fan1 = state_dim + action_dim

    w1_s = jnp.zeros((state_dim, hp), jnp.float32).at[:, :hidden_dim].set(
        uniform(k1s, (state_dim, hidden_dim), fan1))
    w1_a = jnp.zeros((action_dim, hp), jnp.float32).at[:, :hidden_dim].set(
        uniform(k1a, (action_dim, hidden_dim), fan1))
    b1 = jnp.zeros((1, hp), jnp.float32).at[:, :hidden_dim].set(
        uniform(kb1, (1, hidden_dim), fan1))

    w2 = jnp.zeros((hp, hp), jnp.float32).at[:hidden_dim, :hidden_dim].set(
        uniform(k2, (hidden_dim, hidden_dim), hidden_dim))
    b2 = jnp.zeros((1, hp), jnp.float32).at[:, :hidden_dim].set(
        uniform(kb2, (1, hidden_dim), hidden_dim))

    w3 = jnp.zeros((hp, 128), jnp.float32).at[:hidden_dim, 0].set(
        uniform(k3, (hidden_dim,), hidden_dim))
    b3 = jnp.zeros((1, 128), jnp.float32).at[0, 0].set(
        uniform(kb3, (), hidden_dim))

    return (w1_s.astype(jnp.bfloat16), w1_a.astype(jnp.bfloat16), b1,
            w2.astype(jnp.bfloat16), b2, w3, b3)


def critic_reference(state, action, params):
    """Pure-JAX (f32) reference for correctness checking."""
    w1_s, w1_a, b1, w2, b2, w3, b3 = params
    h1 = jax.nn.relu(state @ w1_s.astype(jnp.float32)
                     + action @ w1_a.astype(jnp.float32) + b1)
    h2 = jax.nn.relu(h1 @ w2.astype(jnp.float32) + b2)
    return (h2 @ w3 + b3)[:, :1]


if __name__ == "__main__":
    state_dim, action_dim, hidden_dim = 8, 4, 32

    key = jax.random.PRNGKey(0)
    k_params, k_data = jax.random.split(key)
    params = init_critic_params(k_params, state_dim, action_dim, hidden_dim)

    # batch=2: tiny demo (single grid step); batch=300: non-divisible batch
    # that exercises the partial last tile and the multi-step "parallel" grid.
    for batch in (2, 300):
        ks, ka = jax.random.split(jax.random.fold_in(k_data, batch))
        state = jax.random.normal(ks, (batch, state_dim), jnp.float32)
        action = jax.random.normal(ka, (batch, action_dim), jnp.float32)

        out = jax.block_until_ready(critic_forward(state, action, params))
        ref = critic_reference(state, action, params)

        assert out.shape == (batch, 1), out.shape
        # bf16 matmul operands -> relaxed tolerance vs the f32 reference.
        assert jnp.allclose(out, ref, atol=2e-2, rtol=2e-2), (batch, out, ref)

    print("KERNEL_OK")
</pallas_src>

<mosaic_0001>
module attributes {stable_mosaic.version = 11 : i64} {
  func.func @_critic_kernel(%arg0: i32, %arg1: memref<2x8xf32, #tpu.memory_space<vmem>>, %arg2: memref<2x4xf32, #tpu.memory_space<vmem>>, %arg3: memref<8x128xbf16, #tpu.memory_space<vmem>>, %arg4: memref<4x128xbf16, #tpu.memory_space<vmem>>, %arg5: memref<1x128xf32, #tpu.memory_space<vmem>>, %arg6: memref<128x128xbf16, #tpu.memory_space<vmem>>, %arg7: memref<1x128xf32, #tpu.memory_space<vmem>>, %arg8: memref<128x128xf32, #tpu.memory_space<vmem>>, %arg9: memref<1x128xf32, #tpu.memory_space<vmem>>, %arg10: memref<2x128xf32, #tpu.memory_space<vmem>>) attributes {dimension_semantics = [#tpu.dimension_semantics<parallel>], iteration_bounds = array<i64: 1>, scalar_prefetch = 0 : i64, scratch_operands = 0 : i64, tpu.core_type = #tpu.core_type<tc>, window_params = [{transform_indices = @transform_0, window_bounds = array<i64: 2, 8>}, {transform_indices = @transform_1, window_bounds = array<i64: 2, 4>}, {pipeline_mode = #tpu.pipeline_mode<synchronous>, transform_indices = @transform_2, window_bounds = array<i64: 8, 128>}, {pipeline_mode = #tpu.pipeline_mode<synchronous>, transform_indices = @transform_3, window_bounds = array<i64: 4, 128>}, {pipeline_mode = #tpu.pipeline_mode<synchronous>, transform_indices = @transform_4, window_bounds = array<i64: 1, 128>}, {pipeline_mode = #tpu.pipeline_mode<synchronous>, transform_indices = @transform_5, window_bounds = array<i64: 128, 128>}, {pipeline_mode = #tpu.pipeline_mode<synchronous>, transform_indices = @transform_6, window_bounds = array<i64: 1, 128>}, {pipeline_mode = #tpu.pipeline_mode<synchronous>, transform_indices = @transform_7, window_bounds = array<i64: 128, 128>}, {pipeline_mode = #tpu.pipeline_mode<synchronous>, transform_indices = @transform_8, window_bounds = array<i64: 1, 128>}, {transform_indices = @transform_9, window_bounds = array<i64: 2, 128>}]} {
    %c0 = arith.constant 0 : index
    %c0_0 = arith.constant 0 : index
    %0 = vector.load %arg1[%c0, %c0_0] : memref<2x8xf32, #tpu.memory_space<vmem>>, vector<2x8xf32>
    %1 = arith.truncf %0 : vector<2x8xf32> to vector<2x8xbf16>
    %c0_1 = arith.constant 0 : index
    %c0_2 = arith.constant 0 : index
    %2 = vector.load %arg2[%c0_1, %c0_2] : memref<2x4xf32, #tpu.memory_space<vmem>>, vector<2x4xf32>
    %3 = arith.truncf %2 : vector<2x4xf32> to vector<2x4xbf16>
    %c0_3 = arith.constant 0 : index
    %c0_4 = arith.constant 0 : index
    %4 = vector.load %arg3[%c0_3, %c0_4] : memref<8x128xbf16, #tpu.memory_space<vmem>>, vector<8x128xbf16>
    %cst = arith.constant dense<0.000000e+00> : vector<2x128xf32>
    %5 = tpu.matmul %1, %4, %cst {dimension_numbers = #tpu.dot_dimension_numbers<[1], [0], [0], [1], [0, 0, 1, 1], [], []>} : vector<2x8xbf16>, vector<8x128xbf16>, vector<2x128xf32> -> vector<2x128xf32>
    %c0_5 = arith.constant 0 : index
    %c0_6 = arith.constant 0 : index
    %6 = vector.load %arg4[%c0_5, %c0_6] : memref<4x128xbf16, #tpu.memory_space<vmem>>, vector<4x128xbf16>
    %cst_7 = arith.constant dense<0.000000e+00> : vector<2x128xf32>
    %7 = tpu.matmul %3, %6, %cst_7 {dimension_numbers = #tpu.dot_dimension_numbers<[1], [0], [0], [1], [0, 0, 1, 1], [], []>} : vector<2x4xbf16>, vector<4x128xbf16>, vector<2x128xf32> -> vector<2x128xf32>
    %8 = arith.addf %5, %7 : vector<2x128xf32>
    %c0_8 = arith.constant 0 : index
    %c0_9 = arith.constant 0 : index
    %9 = vector.load %arg5[%c0_8, %c0_9] : memref<1x128xf32, #tpu.memory_space<vmem>>, vector<1x128xf32>
    %10 = vector.broadcast %9 : vector<1x128xf32> to vector<2x128xf32>
    %11 = arith.addf %8, %10 : vector<2x128xf32>
    %cst_10 = arith.constant 0.000000e+00 : f32
    %12 = vector.broadcast %cst_10 : f32 to vector<2x128xf32>
    %13 = arith.maximumf %11, %12 : vector<2x128xf32>
    %14 = arith.truncf %13 : vector<2x128xf32> to vector<2x128xbf16>
    %c0_11 = arith.constant 0 : index
    %c0_12 = arith.constant 0 : index
    %15 = vector.load %arg6[%c0_11, %c0_12] : memref<128x128xbf16, #tpu.memory_space<vmem>>, vector<128x128xbf16>
    %cst_13 = arith.constant dense<0.000000e+00> : vector<2x128xf32>
    %16 = tpu.matmul %14, %15, %cst_13 {dimension_numbers = #tpu.dot_dimension_numbers<[1], [0], [0], [1], [0, 0, 1, 1], [], []>} : vector<2x128xbf16>, vector<128x128xbf16>, vector<2x128xf32> -> vector<2x128xf32>
    %c0_14 = arith.constant 0 : index
    %c0_15 = arith.constant 0 : index
    %17 = vector.load %arg7[%c0_14, %c0_15] : memref<1x128xf32, #tpu.memory_space<vmem>>, vector<1x128xf32>
    %18 = vector.broadcast %17 : vector<1x128xf32> to vector<2x128xf32>
    %19 = arith.addf %16, %18 : vector<2x128xf32>
    %cst_16 = arith.constant 0.000000e+00 : f32
    %20 = vector.broadcast %cst_16 : f32 to vector<2x128xf32>
    %21 = arith.maximumf %19, %20 : vector<2x128xf32>
    %c0_17 = arith.constant 0 : index
    %c0_18 = arith.constant 0 : index
    %22 = vector.load %arg8[%c0_17, %c0_18] : memref<128x128xf32, #tpu.memory_space<vmem>>, vector<128x128xf32>
    %cst_19 = arith.constant dense<0.000000e+00> : vector<2x128xf32>
    %23 = tpu.matmul %21, %22, %cst_19 {dimension_numbers = #tpu.dot_dimension_numbers<[1], [0], [0], [1], [0, 0, 1, 1], [], []>} : vector<2x128xf32>, vector<128x128xf32>, vector<2x128xf32> -> vector<2x128xf32>
    %c0_20 = arith.constant 0 : index
    %c0_21 = arith.constant 0 : index
    %24 = vector.load %arg9[%c0_20, %c0_21] : memref<1x128xf32, #tpu.memory_space<vmem>>, vector<1x128xf32>
    %25 = vector.broadcast %24 : vector<1x128xf32> to vector<2x128xf32>
    %26 = arith.addf %23, %25 : vector<2x128xf32>
    %c0_22 = arith.constant 0 : index
    %c0_23 = arith.constant 0 : index
    %27 = vector.load %arg10[%c0_22, %c0_23] : memref<2x128xf32, #tpu.memory_space<vmem>>, vector<2x128xf32>
    tpu.vector_store %arg10[%c0_22, %c0_23], %26 {strides = array<i32>} : memref<2x128xf32, #tpu.memory_space<vmem>>, vector<2x128xf32>,
    return
  }
  func.func @transform_0(%arg0: i32) -> (i32, i32) {
    %c0_i32 = arith.constant 0 : i32
    %c0_i32_0 = arith.constant 0 : i32
    return %arg0, %c0_i32 : i32, i32
  }
  func.func @transform_1(%arg0: i32) -> (i32, i32) {
    %c0_i32 = arith.constant 0 : i32
    %c0_i32_0 = arith.constant 0 : i32
    return %arg0, %c0_i32 : i32, i32
  }
  func.func @transform_2(%arg0: i32) -> (i32, i32) {
    %c0_i32 = arith.constant 0 : i32
    %c0_i32_0 = arith.constant 0 : i32
    %c0_i32_1 = arith.constant 0 : i32
    return %c0_i32, %c0_i32_0 : i32, i32
  }
  func.func @transform_3(%arg0: i32) -> (i32, i32) {
    %c0_i32 = arith.constant 0 : i32
    %c0_i32_0 = arith.constant 0 : i32
    %c0_i32_1 = arith.constant 0 : i32
    return %c0_i32, %c0_i32_0 : i32, i32
  }
  func.func @transform_4(%arg0: i32) -> (i32, i32) {
    %c0_i32 = arith.constant 0 : i32
    %c0_i32_0 = arith.constant 0 : i32
    %c0_i32_1 = arith.constant 0 : i32
    return %c0_i32, %c0_i32_0 : i32, i32
  }
  func.func @transform_5(%arg0: i32) -> (i32, i32) {
    %c0_i32 = arith.constant 0 : i32
    %c0_i32_0 = arith.constant 0 : i32
    %c0_i32_1 = arith.constant 0 : i32
    return %c0_i32, %c0_i32_0 : i32, i32
  }
  func.func @transform_6(%arg0: i32) -> (i32, i32) {
    %c0_i32 = arith.constant 0 : i32
    %c0_i32_0 = arith.constant 0 : i32
    %c0_i32_1 = arith.constant 0 : i32
    return %c0_i32, %c0_i32_0 : i32, i32
  }
  func.func @transform_7(%arg0: i32) -> (i32, i32) {
    %c0_i32 = arith.constant 0 : i32
    %c0_i32_0 = arith.constant 0 : i32
    %c0_i32_1 = arith.constant 0 : i32
    return %c0_i32, %c0_i32_0 : i32, i32
  }
  func.func @transform_8(%arg0: i32) -> (i32, i32) {
    %c0_i32 = arith.constant 0 : i32
    %c0_i32_0 = arith.constant 0 : i32
    %c0_i32_1 = arith.constant 0 : i32
    return %c0_i32, %c0_i32_0 : i32, i32
  }
  func.func @transform_9(%arg0: i32) -> (i32, i32) {
    %c0_i32 = arith.constant 0 : i32
    %c0_i32_0 = arith.constant 0 : i32
    return %arg0, %c0_i32 : i32, i32
  }
}

module attributes {stable_mosaic.version = 11 : i64} {
  func.func @_critic_kernel(%arg0: i32, %arg1: memref<2x8xf32, #tpu.memory_space<vmem>>, %arg2: memref<2x4xf32, #tpu.memory_space<vmem>>, %arg3: memref<8x128xbf16, #tpu.memory_space<vmem>>, %arg4: memref<4x128xbf16, #tpu.memory_space<vmem>>, %arg5: memref<1x128xf32, #tpu.memory_space<vmem>>, %arg6: memref<128x128xbf16, #tpu.memory_space<vmem>>, %arg7: memref<1x128xf32, #tpu.memory_space<vmem>>, %arg8: memref<128x128xf32, #tpu.memory_space<vmem>>, %arg9: memref<1x128xf32, #tpu.memory_space<vmem>>, %arg10: memref<2x128xf32, #tpu.memory_space<vmem>>) attributes {dimension_semantics = [#tpu.dimension_semantics<parallel>], iteration_bounds = array<i64: 1>, scalar_prefetch = 0 : i64, scratch_operands = 0 : i64, tpu.core_type = #tpu.core_type<tc>, window_params = [{transform_indices = @transform_0, window_bounds = array<i64: 2, 8>}, {transform_indices = @transform_1, window_bounds = array<i64: 2, 4>}, {pipeline_mode = #tpu.pipeline_mode<synchronous>, transform_indices = @transform_2, window_bounds = array<i64: 8, 128>}, {pipeline_mode = #tpu.pipeline_mode<synchronous>, transform_indices = @transform_3, window_bounds = array<i64: 4, 128>}, {pipeline_mode = #tpu.pipeline_mode<synchronous>, transform_indices = @transform_4, window_bounds = array<i64: 1, 128>}, {pipeline_mode = #tpu.pipeline_mode<synchronous>, transform_indices = @transform_5, window_bounds = array<i64: 128, 128>}, {pipeline_mode = #tpu.pipeline_mode<synchronous>, transform_indices = @transform_6, window_bounds = array<i64: 1, 128>}, {pipeline_mode = #tpu.pipeline_mode<synchronous>, transform_indices = @transform_7, window_bounds = array<i64: 128, 128>}, {pipeline_mode = #tpu.pipeline_mode<synchronous>, transform_indices = @transform_8, window_bounds = array<i64: 1, 128>}, {transform_indices = @transform_9, window_bounds = array<i64: 2, 128>}]} {
    %c0 = arith.constant 0 : index
    %c0_0 = arith.constant 0 : index
    %0 = vector.load %arg1[%c0, %c0_0] : memref<2x8xf32, #tpu.memory_space<vmem>>, vector<2x8xf32>
    %1 = arith.truncf %0 : vector<2x8xf32> to vector<2x8xbf16>
    %c0_1 = arith.constant 0 : index
    %c0_2 = arith.constant 0 : index
    %2 = vector.load %arg2[%c0_1, %c0_2] : memref<2x4xf32, #tpu.memory_space<vmem>>, vector<2x4xf32>
    %3 = arith.truncf %2 : vector<2x4xf32> to vector<2x4xbf16>
    %c0_3 = arith.constant 0 : index
    %c0_4 = arith.constant 0 : index
    %4 = vector.load %arg3[%c0_3, %c0_4] : memref<8x128xbf16, #tpu.memory_space<vmem>>, vector<8x128xbf16>
    %cst = arith.constant dense<0.000000e+00> : vector<2x128xf32>
    %5 = tpu.matmul %1, %4, %cst {dimension_numbers = #tpu.dot_dimension_numbers<[1], [0], [0], [1], [0, 0, 1, 1], [], []>} : vector<2x8xbf16>, vector<8x128xbf16>, vector<2x128xf32> -> vector<2x128xf32>
    %c0_5 = arith.constant 0 : index
    %c0_6 = arith.constant 0 : index
    %6 = vector.load %arg4[%c0_5, %c0_6] : memref<4x128xbf16, #tpu.memory_space<vmem>>, vector<4x128xbf16>
    %cst_7 = arith.constant dense<0.000000e+00> : vector<2x128xf32>
    %7 = tpu.matmul %3, %6, %cst_7 {dimension_numbers = #tpu.dot_dimension_numbers<[1], [0], [0], [1], [0, 0, 1, 1], [], []>} : vector<2x4xbf16>, vector<4x128xbf16>, vector<2x128xf32> -> vector<2x128xf32>
    %8 = arith.addf %5, %7 : vector<2x128xf32>
    %c0_8 = arith.constant 0 : index
    %c0_9 = arith.constant 0 : index
    %9 = vector.load %arg5[%c0_8, %c0_9] : memref<1x128xf32, #tpu.memory_space<vmem>>, vector<1x128xf32>
    %10 = vector.broadcast %9 : vector<1x128xf32> to vector<2x128xf32>
    %11 = arith.addf %8, %10 : vector<2x128xf32>
    %cst_10 = arith.constant 0.000000e+00 : f32
    %12 = vector.broadcast %cst_10 : f32 to vector<2x128xf32>
    %13 = arith.maximumf %11, %12 : vector<2x128xf32>
    %14 = arith.truncf %13 : vector<2x128xf32> to vector<2x128xbf16>
    %c0_11 = arith.constant 0 : index
    %c0_12 = arith.constant 0 : index
    %15 = vector.load %arg6[%c0_11, %c0_12] : memref<128x128xbf16, #tpu.memory_space<vmem>>, vector<128x128xbf16>
    %cst_13 = arith.constant dense<0.000000e+00> : vector<2x128xf32>
    %16 = tpu.matmul %14, %15, %cst_13 {dimension_numbers = #tpu.dot_dimension_numbers<[1], [0], [0], [1], [0, 0, 1, 1], [], []>} : vector<2x128xbf16>, vector<128x128xbf16>, vector<2x128xf32> -> vector<2x128xf32>
    %c0_14 = arith.constant 0 : index
    %c0_15 = arith.constant 0 : index
    %17 = vector.load %arg7[%c0_14, %c0_15] : memref<1x128xf32, #tpu.memory_space<vmem>>, vector<1x128xf32>
    %18 = vector.broadcast %17 : vector<1x128xf32> to vector<2x128xf32>
    %19 = arith.addf %16, %18 : vector<2x128xf32>
    %cst_16 = arith.constant 0.000000e+00 : f32
    %20 = vector.broadcast %cst_16 : f32 to vector<2x128xf32>
    %21 = arith.maximumf %19, %20 : vector<2x128xf32>
    %c0_17 = arith.constant 0 : index
    %c0_18 = arith.constant 0 : index
    %22 = vector.load %arg8[%c0_17, %c0_18] : memref<128x128xf32, #tpu.memory_space<vmem>>, vector<128x128xf32>
    %cst_19 = arith.constant dense<0.000000e+00> : vector<2x128xf32>
    %23 = tpu.matmul %21, %22, %cst_19 {dimension_numbers = #tpu.dot_dimension_numbers<[1], [0], [0], [1], [0, 0, 1, 1], [], []>} : vector<2x128xf32>, vector<128x128xf32>, vector<2x128xf32> -> vector<2x128xf32>
    %c0_20 = arith.constant 0 : index
    %c0_21 = arith.constant 0 : index
    %24 = vector.load %arg9[%c0_20, %c0_21] : memref<1x128xf32, #tpu.memory_space<vmem>>, vector<1x128xf32>
    %25 = vector.broadcast %24 : vector<1x128xf32> to vector<2x128xf32>
    %26 = arith.addf %23, %25 : vector<2x128xf32>
    %c0_22 = arith.constant 0 : index
    %c0_23 = arith.constant 0 : index
    %27 = vector.load %arg10[%c0_22, %c0_23] : memref<2x128xf32, #tpu.memory_space<vmem>>, vector<2x128xf32>
    tpu.vector_store %arg10[%c0_22, %c0_23], %26 {strides = array<i32>} : memref<2x128xf32, #tpu.memory_space<vmem>>, vector<2x128xf32>,
    return
  }
  func.func @transform_0(%arg0: i32) -> (i32, i32) {
    %c0_i32 = arith.constant 0 : i32
    %c0_i32_0 = arith.constant 0 : i32
    return %arg0, %c0_i32 : i32, i32
  }
  func.func @transform_1(%arg0: i32) -> (i32, i32) {
    %c0_i32 = arith.constant 0 : i32
    %c0_i32_0 = arith.constant 0 : i32
    return %arg0, %c0_i32 : i32, i32
  }
  func.func @transform_2(%arg0: i32) -> (i32, i32) {
    %c0_i32 = arith.constant 0 : i32
    %c0_i32_0 = arith.constant 0 : i32
    %c0_i32_1 = arith.constant 0 : i32
    return %c0_i32, %c0_i32_0 : i32, i32
  }
  func.func @transform_3(%arg0: i32) -> (i32, i32) {
    %c0_i32 = arith.constant 0 : i32
    %c0_i32_0 = arith.constant 0 : i32
    %c0_i32_1 = arith.constant 0 : i32
    return %c0_i32, %c0_i32_0 : i32, i32
  }
  func.func @transform_4(%arg0: i32) -> (i32, i32) {
    %c0_i32 = arith.constant 0 : i32
    %c0_i32_0 = arith.constant 0 : i32
    %c0_i32_1 = arith.constant 0 : i32
    return %c0_i32, %c0_i32_0 : i32, i32
  }
  func.func @transform_5(%arg0: i32) -> (i32, i32) {
    %c0_i32 = arith.constant 0 : i32
    %c0_i32_0 = arith.constant 0 : i32
    %c0_i32_1 = arith.constant 0 : i32
    return %c0_i32, %c0_i32_0 : i32, i32
  }
  func.func @transform_6(%arg0: i32) -> (i32, i32) {
    %c0_i32 = arith.constant 0 : i32
    %c0_i32_0 = arith.constant 0 : i32
    %c0_i32_1 = arith.constant 0 : i32
    return %c0_i32, %c0_i32_0 : i32, i32
  }
  func.func @transform_7(%arg0: i32) -> (i32, i32) {
    %c0_i32 = arith.constant 0 : i32
    %c0_i32_0 = arith.constant 0 : i32
    %c0_i32_1 = arith.constant 0 : i32
    return %c0_i32, %c0_i32_0 : i32, i32
  }
  func.func @transform_8(%arg0: i32) -> (i32, i32) {
    %c0_i32 = arith.constant 0 : i32
    %c0_i32_0 = arith.constant 0 : i32
    %c0_i32_1 = arith.constant 0 : i32
    return %c0_i32, %c0_i32_0 : i32, i32
  }
  func.func @transform_9(%arg0: i32) -> (i32, i32) {
    %c0_i32 = arith.constant 0 : i32
    %c0_i32_0 = arith.constant 0 : i32
    return %arg0, %c0_i32 : i32, i32
  }
}

</mosaic_0001>

<bundles_post_ra>
// kernel: tpu_custom_call.1
= control target key start
LH: loop header
LB: loop body
LE: loop exit
PB: predicated region body
PF: predicated region fallthrough
CT: control target
= control target key end

     0   :  { %14 = vsyncpa [#allocation3], 0  ;;  %s815_s0 = inlined_call_operand.hbm [shape: f32[2,8], index: 0, kind: input, shape index: {}]   ;;  %s816_s1 = inlined_call_operand.hbm [shape: f32[2,4], index: 1, kind: input, shape index: {}]   ;;  %s817_s2 = inlined_call_operand.hbm [shape: bf16[8,128], index: 2, kind: input, shape index: {}]   ;;  %s818_s3 = inlined_call_operand.vmem [shape: bf16[4,128], index: 3, kind: input, shape index: {}]   ;;  %s819_s4 = inlined_call_operand.vmem [shape: f32[1,128], index: 4, kind: input, shape index: {}]   ;;  %s820_s5 = inlined_call_operand.hbm [shape: bf16[128,128], index: 5, kind: input, shape index: {}]   ;;  %s821_s6 = inlined_call_operand.vmem [shape: f32[1,128], index: 6, kind: input, shape index: {}]   ;;  %s822_s7 = inlined_call_operand.hbm [shape: f32[128,128], index: 7, kind: input, shape index: {}]   ;;  %s823_s8 = inlined_call_operand.vmem [shape: f32[1,128], index: 8, kind: input, shape index: {}]   ;;  %s824_s9 = inlined_call_operand.hbm [shape: f32[2,128], index: 9, kind: output, shape index: {}]  }
   0x1   :  { %15 = vsyncpa [#allocation6], 0 }
   0x2   :  { %16 = vsyncpa [#allocation9], 0 }
   0x3   :  { %17 = vsyncpa [#allocation4], 0  ;;  %s689_s30 = smov [#allocation5]   ;;  %s690_s11 = smov [#allocation8]  }
   0x4   :  { %s34_s10 = sshll.u32 %s689_s30, 4  ;;  %s57_s12 = sshll.u32 %s690_s11, 4  ;;  %s35_s10 = int_to_ptr.vmem [resolvable:$true] %s34_s10  ;;  %s58_s12 = int_to_ptr.vmem [resolvable:$true] %s57_s12 }
   0x5   :  { %s569_s13 = scalar_lea.vmem %s35_s10, 32  ;;  %p574_p1 = scmp.lt.s32.totalorder %s35_s10, %s35_s10 }
   0x6   :  { %p570_p0 = scmp.ne.s32.totalorder %s35_s10, %s569_s13  ;;  %p575_p2 = scmp.lt.s32.totalorder %s569_s13, %s569_s13 }
   0x8   :  { %p576_p3 = por %p575_p2, %p574_p1 }
   0xa   :  { %p577_p4 = pnand %p576_p3, %p570_p0 }
   0xc   :  { %580 = shalt.err (!%p577_p4)
}
   0xd   :  { %37 = dma.hbm_to_vmem [thread:$0]  %s816_s1, 32, %s35_s10, [#allocation6]  }
   0xe   :  { %s589_s16 = scalar_lea.vmem %s58_s12, 1024  ;;  %p594_p6 = scmp.lt.s32.totalorder %s58_s12, %s58_s12 }
   0xf   :  { %p590_p5 = scmp.ne.s32.totalorder %s58_s12, %s589_s16  ;;  %p595_p7 = scmp.lt.s32.totalorder %s589_s16, %s589_s16 }
  0x11   :  { %p596_p8 = por %p595_p7, %p594_p6 }
  0x13   :  { %p597_p9 = pnand %p596_p8, %p590_p5 }
  0x15   :  { %600 = shalt.err (!%p597_p9)
}
  0x16   :  { %s691_s17 = smov 64   ;;  %s692_s18 = smov 4  }
  0x17   :  { %63 = dma.hbm_to_vmem [thread:$0]  %s820_s5, 1024, %s58_s12, [#allocation9], %s691_s17, %s691_s17, %s692_s18  }
  0x18   :  { %s693_s21 = smov [#allocation2]   ;;  %s694_s23 = smov [#allocation7]  }
  0x19   :  { %s24_s22 = sshll.u32 %s693_s21, 4  ;;  %s44_s24 = sshll.u32 %s694_s23, 4  ;;  %s25_s22 = int_to_ptr.vmem [resolvable:$true] %s24_s22  ;;  %s45_s24 = int_to_ptr.vmem [resolvable:$true] %s44_s24 }
  0x1a   :  { %s609_s1 = scalar_lea.vmem %s25_s22, 32  ;;  %p614_p11 = scmp.lt.s32.totalorder %s25_s22, %s25_s22 }
  0x1b   :  { %p610_p10 = scmp.ne.s32.totalorder %s25_s22, %s609_s1  ;;  %p615_p12 = scmp.lt.s32.totalorder %s609_s1, %s609_s1 }
  0x1d   :  { %p616_p13 = por %p615_p12, %p614_p11 }
  0x1f   :  { %p617_p0 = pnand %p616_p13, %p610_p10 }
  0x21   :  { %620 = shalt.err (!%p617_p0)
}
  0x22   :  { %27 = dma.hbm_to_vmem [thread:$0]  %s815_s0, 32, %s25_s22, [#allocation3]  }
  0x23   :  { %s629_s27 = scalar_lea.vmem %s45_s24, 64  ;;  %p634_p2 = scmp.lt.s32.totalorder %s45_s24, %s45_s24 }
  0x24   :  { %p630_p1 = scmp.ne.s32.totalorder %s45_s24, %s629_s27  ;;  %p635_p3 = scmp.lt.s32.totalorder %s629_s27, %s629_s27 }
  0x26   :  { %p636_p4 = por %p635_p3, %p634_p2 }
  0x28   :  { %p637_p5 = pnand %p636_p4, %p630_p1 }
  0x2a   :  { %640 = shalt.err (!%p637_p5)
}
  0x2b   :  { %47 = dma.hbm_to_vmem [thread:$0]  %s817_s2, 64, %s45_s24, [#allocation6]  }
  0x2c   :  { %s695_s29 = smov [#allocation10]  }
  0x2d   :  { %s71_s30 = sshll.u32 %s695_s29, 4  ;;  %s72_s30 = int_to_ptr.vmem [resolvable:$true] %s71_s30 }
  0x2e   :  { %s649_s10 = scalar_lea.vmem %s72_s30, 2048  ;;  %p654_p7 = scmp.lt.s32.totalorder %s72_s30, %s72_s30 }
  0x2f   :  { %p650_p6 = scmp.ne.s32.totalorder %s72_s30, %s649_s10  ;;  %p655_p8 = scmp.lt.s32.totalorder %s649_s10, %s649_s10 }
  0x31   :  { %p656_p9 = por %p655_p8, %p654_p7 }
  0x33   :  { %p657_p10 = pnand %p656_p9, %p650_p6 }
  0x35   :  { %660 = shalt.err (!%p657_p10)
}
  0x36   :  { %s696_s0 = smov 128   ;;  %s697_s11 = smov 8  }
  0x37   :  { %77 = dma.hbm_to_vmem [thread:$0]  %s822_s7, 2048, %s72_s30, [#allocation9], %s696_s0, %s696_s0, %s697_s11  }
  0x38   :  { %681 = dma.done.wait [#allocation3], 32  }
  0x39   :  { %682 = vsyncadd [#allocation3], 4294967264 }
  0x3a   :  { %683 = dma.done.wait [#allocation6], 96  }
  0x3b   :  { %684 = vsyncadd [#allocation6], 4294967200 }
  0x3c   :  { %685 = dma.done.wait [#allocation9], 3072  }
  0x3d   :  { %686 = vsyncadd [#allocation9], 4294964224  ;;  %v698_v0 = vmov 0.0   ;;  %vm699_vm0 = vmmov 0   ;;  %vm106_vm1 = vcmask 1041408   ;;  %vm154_vm2 = vcmask 1043456  }
  0x3e   :  { %474 = vmatprep.subr.bf16.mxu0 %v698_v0  ;;  %480 = vmatprep.subr.bf16.mxu1 %v698_v0  ;;  %vm102_vm3 = vcmask 31744   ;;  %v101_v1 = vld [vmem:[%s818_s3] sm:$0x3]  ;;  %v100_v2 = vld [vmem:[#allocation7] sm:$0xf]  ;;  %vm150_vm4 = vcmask 64512  }
  0x3f   :  { %476 = vmatprep.mubr.msk.bf16.mxu0 %vm699_vm0, %v698_v0  ;;  %482 = vmatprep.mubr.msk.bf16.mxu1 %vm699_vm0, %v698_v0  ;;  %v98_v3 = vld [vmem:[#allocation5] sm:$0x3]  ;;  %v108_v4 = vsel %vm106_vm1, %v101_v1, 0  ;;  %v156_v5 = vsel %vm154_vm2, %v100_v2, 0  ;;  %v96_v7 = vld [vmem:[#allocation2] sm:$0x3] }
  0x40   :  { %v99_v6 = vpack.c.bf16 %v98_v3, %v98_v3  ;;  %475 = vmatpush3.bf16.msra.mxu0 %v108_v4  ;;  %481 = vmatpush3.bf16.msra.mxu1 %v156_v5  ;;  %v97_v8 = vpack.c.bf16 %v96_v7, %v96_v7  ;;  %v553_v9 = vld [vmem:[#allocation8 + $0x38] sm:$0xff]   ;;  %v554_v10 = vld [vmem:[#allocation8 + $0x30] sm:$0xff]   ;;  %v555_v11 = vld [vmem:[#allocation8 + $0x28] sm:$0xff]   ;;  %s700_s18 = smov [#allocation11]  }
  0x41   :  { %486 = vmatprep.subr.bf16.mxu0 %v698_v0  ;;  %506 = vmatprep.subr.mxu1 %v698_v0  ;;  %v556_v12 = vld [vmem:[#allocation8 + $0x20] sm:$0xff]   ;;  %v557_v13 = vld [vmem:[#allocation8 + $0x18] sm:$0xff]   ;;  %v558_v14 = vld [vmem:[#allocation8 + $0x10] sm:$0xff]   ;;  %s420_s19 = sshll.u32 %s700_s18, 4  ;;  %s421_s19 = int_to_ptr.vmem [resolvable:$true] %s420_s19 }
  0x42   :  { %v559_v15 = vld [vmem:[#allocation8 + $0x8] sm:$0xff]   ;;  %v560_v16 = vld [vmem:[#allocation8] sm:$0xff]   ;;  %v335_v17 = vld [vmem:[#allocation10 + $0x78] sm:$0xff]  ;;  %s661_s20 = scalar_lea.vmem %s421_s19, 32  ;;  %p666_p12 = scmp.lt.s32.totalorder %s421_s19, %s421_s19 }
  0x43   :  { %477 = vmatmul.mubr.msk.bf16.vlgmr.msra.gmra.mxu0 %vm102_vm3, %v99_v6  ;;  %483 = vmatmul.mubr.msk.bf16.vlgmr.msra.gmra.mxu1 %vm150_vm4, %v97_v8  ;;  %v334_v18 = vld [vmem:[#allocation10 + $0x70] sm:$0xff]  ;;  %v333_v19 = vld [vmem:[#allocation10 + $0x68] sm:$0xff]  ;;  %v332_v20 = vld [vmem:[#allocation10 + $0x60] sm:$0xff]  ;;  %p662_p11 = scmp.ne.s32.totalorder %s421_s19, %s661_s20  ;;  %p667_p13 = scmp.lt.s32.totalorder %s661_s20, %s661_s20 }
  0x44   :  { %487 = vmatpush3.bf16.msra.mxu0 %v553_v9  ;;  %502 = vmatprep.mubr.msk.bf16.mxu0 %vm699_vm0, %v698_v0  ;;  %v331_v21 = vld [vmem:[#allocation10 + $0x58] sm:$0xff]  ;;  %v330_v22 = vld [vmem:[#allocation10 + $0x50] sm:$0xff]  ;;  %v329_v23 = vld [vmem:[#allocation10 + $0x48] sm:$0xff] }
  0x45   :  { %488 = vmatprep.subr.bf16.mxu0 %v698_v0  ;;  %538 = vmatprep.mubr.msk.f32.mxu1 %vm699_vm0, %v698_v0  ;;  %v328_v24 = vld [vmem:[#allocation10 + $0x40] sm:$0xff]  ;;  %v327_v25 = vld [vmem:[#allocation10 + $0x38] sm:$0xff]  ;;  %v326_v26 = vld [vmem:[#allocation10 + $0x30] sm:$0xff]  ;;  %p668_p0 = por %p667_p13, %p666_p12 }
  0x46   :  { %507 = vmatpush3.msra.mxu1 %v335_v17  ;;  %v325_v27 = vld [vmem:[#allocation10 + $0x28] sm:$0xff]  ;;  %v324_v28 = vld [vmem:[#allocation10 + $0x20] sm:$0xff]  ;;  %v323_v29 = vld [vmem:[#allocation10 + $0x18] sm:$0xff] }
  0x47   :  { %508 = vmatprep.subr.mxu1 %v698_v0  ;;  %v433_v32 = vld [vmem:[%s819_s4] ss:$0 sm:$0xff]  ;;  %v322_v43 = vld [vmem:[#allocation10 + $0x10] sm:$0xff]  ;;  %v321_v44 = vld [vmem:[#allocation10 + $0x8] sm:$0xff]  ;;  %p669_p1 = pnand %p668_p0, %p662_p11 }
  0x48   :  { %489 = vmatpush3.bf16.msra.mxu0 %v554_v10  ;;  %509 = vmatpush3.msra.mxu1 %v334_v18  ;;  %v320_v45 = vld [vmem:[#allocation10] sm:$0xff]  ;;  %v434_v46 = vld [vmem:[%s821_s6] ss:$0 sm:$0xff] }
  0x49   :  { %490 = vmatprep.subr.bf16.mxu0 %v698_v0  ;;  %510 = vmatprep.subr.mxu1 %v698_v0  ;;  %v443_v53 = vld [vmem:[%s823_s8] ss:$0 sm:$0xff] }
  0x4a   :  { %511 = vmatpush3.msra.mxu1 %v333_v19 }
  0x4b   :  { %512 = vmatprep.subr.mxu1 %v698_v0 }
  0x4c   :  { %491 = vmatpush3.bf16.msra.mxu0 %v555_v11  ;;  %513 = vmatpush3.msra.mxu1 %v332_v20 }
  0x4d   :  { %492 = vmatprep.subr.bf16.mxu0 %v698_v0  ;;  %514 = vmatprep.subr.mxu1 %v698_v0 }
  0x4e   :  { %515 = vmatpush3.msra.mxu1 %v331_v21 }
  0x4f   :  { %516 = vmatprep.subr.mxu1 %v698_v0 }
  0x50   :  { %493 = vmatpush3.bf16.msra.mxu0 %v556_v12  ;;  %517 = vmatpush3.msra.mxu1 %v330_v22 }
  0x51   :  { %494 = vmatprep.subr.bf16.mxu0 %v698_v0  ;;  %518 = vmatprep.subr.mxu1 %v698_v0 }
  0x52   :  { %519 = vmatpush3.msra.mxu1 %v329_v23 }
  0x53   :  { %520 = vmatprep.subr.mxu1 %v698_v0 }
  0x54   :  { %495 = vmatpush3.bf16.msra.mxu0 %v557_v13  ;;  %521 = vmatpush3.msra.mxu1 %v328_v24 }
  0x55   :  { %496 = vmatprep.subr.bf16.mxu0 %v698_v0  ;;  %522 = vmatprep.subr.mxu1 %v698_v0 }
  0x56   :  { %523 = vmatpush3.msra.mxu1 %v327_v25 }
  0x57   :  { %524 = vmatprep.subr.mxu1 %v698_v0 }
  0x58   :  { %497 = vmatpush3.bf16.msra.mxu0 %v558_v14  ;;  %525 = vmatpush3.msra.mxu1 %v326_v26 }
  0x59   :  { %498 = vmatprep.subr.bf16.mxu0 %v698_v0  ;;  %526 = vmatprep.subr.mxu1 %v698_v0 }
  0x5a   :  { %527 = vmatpush3.msra.mxu1 %v325_v27 }
  0x5b   :  { %528 = vmatprep.subr.mxu1 %v698_v0 }
  0x5c   :  { %499 = vmatpush3.bf16.msra.mxu0 %v559_v15  ;;  %529 = vmatpush3.msra.mxu1 %v324_v28 }
  0x5d   :  { %500 = vmatprep.subr.bf16.mxu0 %v698_v0  ;;  %530 = vmatprep.subr.mxu1 %v698_v0 }
  0x5e   :  { %531 = vmatpush3.msra.mxu1 %v323_v29 }
  0x5f   :  { %532 = vmatprep.subr.mxu1 %v698_v0 }
  0x60   :  { %501 = vmatpush3.bf16.msra.mxu0 %v560_v16  ;;  %533 = vmatpush3.msra.mxu1 %v322_v43 }
  0x61   :  { %534 = vmatprep.subr.mxu1 %v698_v0 }
  0x62   :  { %535 = vmatpush3.msra.mxu1 %v321_v44 }
  0x63   :  { %536 = vmatprep.subr.mxu1 %v698_v0 }
  0x64   :  { %537 = vmatpush3.msra.mxu1 %v320_v45 }
 0x103   :  { %v144_v30 = vpop.f32.mrf.mxu0  ;;  %v192_v31 = vpop.f32.mrf.mxu1 }
 0x104   :  { %v193_v33 = vadd.f32 %v192_v31, %v144_v30 }
 0x105   :  { %v478_v34 = vpop.f32.mrf.mxu0  ;;  %v484_v35 = vpop.f32.mrf.mxu1 }
 0x106   :  { %v205_v36 = vadd.f32 %v433_v32, %v193_v33 }
 0x107   :  { %v147_v37 = vpop.f32.mrf.mxu0  ;;  %v195_v38 = vpop.f32.mrf.mxu1 }
 0x108   :  { %v206_v39 = vmax.f32 %v205_v36, 0.0 }
 0x109   :  { %v479_v40 = vpop.f32.mrf.mxu0  ;;  %v485_v41 = vpop.f32.mrf.mxu1 }
 0x10a   :  { %v207_v42 = vpack.c.bf16 %v206_v39, %v206_v39 }
 0x10c   :  { %503 = vmatmul.mubr.bf16.vlgmr.msra.gmra.mxu0 %v207_v42 }
 0x1cc   :  { %v313_v47 = vpop.f32.mrf.mxu0 }
 0x1cd   :  { %v314_v48 = vadd.f32 %v434_v46, %v313_v47 }
 0x1ce   :  { %v504_v49 = vpop.f32.mrf.mxu0 }
 0x1cf   :  { %v319_v50 = vmax.f32 %v314_v48, 0.0 }
 0x1d0   :  { %v316_v51 = vpop.f32.mrf.mxu0 }
 0x1d1   :  { %539 = vmatmul.mubr.f32.vlgmr.msra.gmra.mxu1 %v319_v50 }
 0x1d2   :  { %v505_v52 = vpop.f32.mrf.mxu0 }
 0x291   :  { %v409_v54 = vpop.f32.mrf.mxu1 }
 0x292   :  { %v410_v55 = vadd.f32 %v443_v53, %v409_v54 }
 0x293   :  { %v540_v56 = vpop.f32.mrf.mxu1 }
 0x294   :  { %413 = vst [vmem:[#allocation11] sm:$0x3] %v410_v55 }
 0x295   :  { %672 = shalt.err (!%p669_p1)
}
 0x296   :  { %423 = dma.vmem_to_hbm [thread:$0]  %s421_s19, 32, %s824_s9, [#allocation4]  }
 0x297   :  { %687 = dma.done.wait [#allocation4], 32  }
 0x298   :  { %688 = vsyncadd [#allocation4], 4294967264 }
 0x299   :  { %427 = vsyncpa [#allocation3], 1 }
 0x29a   :  { %428 = vsyncpa [#allocation6], 1 }
 0x29b   :  { %429 = vsyncpa [#allocation9], 1 }
 0x29c   :  { %430 = vsyncpa [#allocation4], 1 }

// kernel: tpu_custom_call.1
= control target key start
LH: loop header
LB: loop body
LE: loop exit
PB: predicated region body
PF: predicated region fallthrough
CT: control target
= control target key end

     0   :  { %14 = vsyncpa [#allocation3], 0  ;;  %s815_s0 = inlined_call_operand.hbm [shape: f32[2,8], index: 0, kind: input, shape index: {}]   ;;  %s816_s1 = inlined_call_operand.hbm [shape: f32[2,4], index: 1, kind: input, shape index: {}]   ;;  %s817_s2 = inlined_call_operand.hbm [shape: bf16[8,128], index: 2, kind: input, shape index: {}]   ;;  %s818_s3 = inlined_call_operand.vmem [shape: bf16[4,128], index: 3, kind: input, shape index: {}]   ;;  %s819_s4 = inlined_call_operand.vmem [shape: f32[1,128], index: 4, kind: input, shape index: {}]   ;;  %s820_s5 = inlined_call_operand.hbm [shape: bf16[128,128], index: 5, kind: input, shape index: {}]   ;;  %s821_s6 = inlined_call_operand.vmem [shape: f32[1,128], index: 6, kind: input, shape index: {}]   ;;  %s822_s7 = inlined_call_operand.hbm [shape: f32[128,128], index: 7, kind: input, shape index: {}]   ;;  %s823_s8 = inlined_call_operand.vmem [shape: f32[1,128], index: 8, kind: input, shape index: {}]   ;;  %s824_s9 = inlined_call_operand.hbm [shape: f32[2,128], index: 9, kind: output, shape index: {}]  }
   0x1   :  { %15 = vsyncpa [#allocation6], 0 }
   0x2   :  { %16 = vsyncpa [#allocation9], 0 }
   0x3   :  { %17 = vsyncpa [#allocation4], 0  ;;  %s689_s30 = smov [#allocation5]   ;;  %s690_s11 = smov [#allocation8]  }
   0x4   :  { %s34_s10 = sshll.u32 %s689_s30, 4  ;;  %s57_s12 = sshll.u32 %s690_s11, 4  ;;  %s35_s10 = int_to_ptr.vmem [resolvable:$true] %s34_s10  ;;  %s58_s12 = int_to_ptr.vmem [resolvable:$true] %s57_s12 }
   0x5   :  { %s569_s13 = scalar_lea.vmem %s35_s10, 32  ;;  %p574_p1 = scmp.lt.s32.totalorder %s35_s10, %s35_s10 }
   0x6   :  { %p570_p0 = scmp.ne.s32.totalorder %s35_s10, %s569_s13  ;;  %p575_p2 = scmp.lt.s32.totalorder %s569_s13, %s569_s13 }
   0x8   :  { %p576_p3 = por %p575_p2, %p574_p1 }
   0xa   :  { %p577_p4 = pnand %p576_p3, %p570_p0 }
   0xc   :  { %580 = shalt.err (!%p577_p4)
}
   0xd   :  { %37 = dma.hbm_to_vmem [thread:$0]  %s816_s1, 32, %s35_s10, [#allocation6]  }
   0xe   :  { %s589_s16 = scalar_lea.vmem %s58_s12, 1024  ;;  %p594_p6 = scmp.lt.s32.totalorder %s58_s12, %s58_s12 }
   0xf   :  { %p590_p5 = scmp.ne.s32.totalorder %s58_s12, %s589_s16  ;;  %p595_p7 = scmp.lt.s32.totalorder %s589_s16, %s589_s16 }
  0x11   :  { %p596_p8 = por %p595_p7, %p594_p6 }
  0x13   :  { %p597_p9 = pnand %p596_p8, %p590_p5 }
  0x15   :  { %600 = shalt.err (!%p597_p9)
}
  0x16   :  { %s691_s17 = smov 64   ;;  %s692_s18 = smov 4  }
  0x17   :  { %63 = dma.hbm_to_vmem [thread:$0]  %s820_s5, 1024, %s58_s12, [#allocation9], %s691_s17, %s691_s17, %s692_s18  }
  0x18   :  { %s693_s21 = smov [#allocation2]   ;;  %s694_s23 = smov [#allocation7]  }
  0x19   :  { %s24_s22 = sshll.u32 %s693_s21, 4  ;;  %s44_s24 = sshll.u32 %s694_s23, 4  ;;  %s25_s22 = int_to_ptr.vmem [resolvable:$true] %s24_s22  ;;  %s45_s24 = int_to_ptr.vmem [resolvable:$true] %s44_s24 }
  0x1a   :  { %s609_s1 = scalar_lea.vmem %s25_s22, 32  ;;  %p614_p11 = scmp.lt.s32.totalorder %s25_s22, %s25_s22 }
  0x1b   :  { %p610_p10 = scmp.ne.s32.totalorder %s25_s22, %s609_s1  ;;  %p615_p12 = scmp.lt.s32.totalorder %s609_s1, %s609_s1 }
  0x1d   :  { %p616_p13 = por %p615_p12, %p614_p11 }
  0x1f   :  { %p617_p0 = pnand %p616_p13, %p610_p10 }
  0x21   :  { %620 = shalt.err (!%p617_p0)
}
  0x22   :  { %27 = dma.hbm_to_vmem [thread:$0]  %s815_s0, 32, %s25_s22, [#allocation3]  }
  0x23   :  { %s629_s27 = scalar_lea.vmem %s45_s24, 64  ;;  %p634_p2 = scmp.lt.s32.totalorder %s45_s24, %s45_s24 }
  0x24   :  { %p630_p1 = scmp.ne.s32.totalorder %s45_s24, %s629_s27  ;;  %p635_p3 = scmp.lt.s32.totalorder %s629_s27, %s629_s27 }
  0x26   :  { %p636_p4 = por %p635_p3, %p634_p2 }
  0x28   :  { %p637_p5 = pnand %p636_p4, %p630_p1 }
  0x2a   :  { %640 = shalt.err (!%p637_p5)
}
  0x2b   :  { %47 = dma.hbm_to_vmem [thread:$0]  %s817_s2, 64, %s45_s24, [#allocation6]  }
  0x2c   :  { %s695_s29 = smov [#allocation10]  }
  0x2d   :  { %s71_s30 = sshll.u32 %s695_s29, 4  ;;  %s72_s30 = int_to_ptr.vmem [resolvable:$true] %s71_s30 }
  0x2e   :  { %s649_s10 = scalar_lea.vmem %s72_s30, 2048  ;;  %p654_p7 = scmp.lt.s32.totalorder %s72_s30, %s72_s30 }
  0x2f   :  { %p650_p6 = scmp.ne.s32.totalorder %s72_s30, %s649_s10  ;;  %p655_p8 = scmp.lt.s32.totalorder %s649_s10, %s649_s10 }
  0x31   :  { %p656_p9 = por %p655_p8, %p654_p7 }
  0x33   :  { %p657_p10 = pnand %p656_p9, %p650_p6 }
  0x35   :  { %660 = shalt.err (!%p657_p10)
}
  0x36   :  { %s696_s0 = smov 128   ;;  %s697_s11 = smov 8  }
  0x37   :  { %77 = dma.hbm_to_vmem [thread:$0]  %s822_s7, 2048, %s72_s30, [#allocation9], %s696_s0, %s696_s0, %s697_s11  }
  0x38   :  { %681 = dma.done.wait [#allocation3], 32  }
  0x39   :  { %682 = vsyncadd [#allocation3], 4294967264 }
  0x3a   :  { %683 = dma.done.wait [#allocation6], 96  }
  0x3b   :  { %684 = vsyncadd [#allocation6], 4294967200 }
  0x3c   :  { %685 = dma.done.wait [#allocation9], 3072  }
  0x3d   :  { %686 = vsyncadd [#allocation9], 4294964224  ;;  %v698_v0 = vmov 0.0   ;;  %vm699_vm0 = vmmov 0   ;;  %vm106_vm1 = vcmask 1041408   ;;  %vm154_vm2 = vcmask 1043456  }
  0x3e   :  { %474 = vmatprep.subr.bf16.mxu0 %v698_v0  ;;  %480 = vmatprep.subr.bf16.mxu1 %v698_v0  ;;  %vm102_vm3 = vcmask 31744   ;;  %v101_v1 = vld [vmem:[%s818_s3] sm:$0x3]  ;;  %v100_v2 = vld [vmem:[#allocation7] sm:$0xf]  ;;  %vm150_vm4 = vcmask 64512  }
  0x3f   :  { %476 = vmatprep.mubr.msk.bf16.mxu0 %vm699_vm0, %v698_v0  ;;  %482 = vmatprep.mubr.msk.bf16.mxu1 %vm699_vm0, %v698_v0  ;;  %v98_v3 = vld [vmem:[#allocation5] sm:$0x3]  ;;  %v108_v4 = vsel %vm106_vm1, %v101_v1, 0  ;;  %v156_v5 = vsel %vm154_vm2, %v100_v2, 0  ;;  %v96_v7 = vld [vmem:[#allocation2] sm:$0x3] }
  0x40   :  { %v99_v6 = vpack.c.bf16 %v98_v3, %v98_v3  ;;  %475 = vmatpush3.bf16.msra.mxu0 %v108_v4  ;;  %481 = vmatpush3.bf16.msra.mxu1 %v156_v5  ;;  %v97_v8 = vpack.c.bf16 %v96_v7, %v96_v7  ;;  %v553_v9 = vld [vmem:[#allocation8 + $0x38] sm:$0xff]   ;;  %v554_v10 = vld [vmem:[#allocation8 + $0x30] sm:$0xff]   ;;  %v555_v11 = vld [vmem:[#allocation8 + $0x28] sm:$0xff]   ;;  %s700_s18 = smov [#allocation11]  }
  0x41   :  { %486 = vmatprep.subr.bf16.mxu0 %v698_v0  ;;  %506 = vmatprep.subr.mxu1 %v698_v0  ;;  %v556_v12 = vld [vmem:[#allocation8 + $0x20] sm:$0xff]   ;;  %v557_v13 = vld [vmem:[#allocation8 + $0x18] sm:$0xff]   ;;  %v558_v14 = vld [vmem:[#allocation8 + $0x10] sm:$0xff]   ;;  %s420_s19 = sshll.u32 %s700_s18, 4  ;;  %s421_s19 = int_to_ptr.vmem [resolvable:$true] %s420_s19 }
  0x42   :  { %v559_v15 = vld [vmem:[#allocation8 + $0x8] sm:$0xff]   ;;  %v560_v16 = vld [vmem:[#allocation8] sm:$0xff]   ;;  %v335_v17 = vld [vmem:[#allocation10 + $0x78] sm:$0xff]  ;;  %s661_s20 = scalar_lea.vmem %s421_s19, 32  ;;  %p666_p12 = scmp.lt.s32.totalorder %s421_s19, %s421_s19 }
  0x43   :  { %477 = vmatmul.mubr.msk.bf16.vlgmr.msra.gmra.mxu0 %vm102_vm3, %v99_v6  ;;  %483 = vmatmul.mubr.msk.bf16.vlgmr.msra.gmra.mxu1 %vm150_vm4, %v97_v8  ;;  %v334_v18 = vld [vmem:[#allocation10 + $0x70] sm:$0xff]  ;;  %v333_v19 = vld [vmem:[#allocation10 + $0x68] sm:$0xff]  ;;  %v332_v20 = vld [vmem:[#allocation10 + $0x60] sm:$0xff]  ;;  %p662_p11 = scmp.ne.s32.totalorder %s421_s19, %s661_s20  ;;  %p667_p13 = scmp.lt.s32.totalorder %s661_s20, %s661_s20 }
  0x44   :  { %487 = vmatpush3.bf16.msra.mxu0 %v553_v9  ;;  %502 = vmatprep.mubr.msk.bf16.mxu0 %vm699_vm0, %v698_v0  ;;  %v331_v21 = vld [vmem:[#allocation10 + $0x58] sm:$0xff]  ;;  %v330_v22 = vld [vmem:[#allocation10 + $0x50] sm:$0xff]  ;;  %v329_v23 = vld [vmem:[#allocation10 + $0x48] sm:$0xff] }
  0x45   :  { %488 = vmatprep.subr.bf16.mxu0 %v698_v0  ;;  %538 = vmatprep.mubr.msk.f32.mxu1 %vm699_vm0, %v698_v0  ;;  %v328_v24 = vld [vmem:[#allocation10 + $0x40] sm:$0xff]  ;;  %v327_v25 = vld [vmem:[#allocation10 + $0x38] sm:$0xff]  ;;  %v326_v26 = vld [vmem:[#allocation10 + $0x30] sm:$0xff]  ;;  %p668_p0 = por %p667_p13, %p666_p12 }
  0x46   :  { %507 = vmatpush3.msra.mxu1 %v335_v17  ;;  %v325_v27 = vld [vmem:[#allocation10 + $0x28] sm:$0xff]  ;;  %v324_v28 = vld [vmem:[#allocation10 + $0x20] sm:$0xff]  ;;  %v323_v29 = vld [vmem:[#allocation10 + $0x18] sm:$0xff] }
  0x47   :  { %508 = vmatprep.subr.mxu1 %v698_v0  ;;  %v433_v32 = vld [vmem:[%s819_s4] ss:$0 sm:$0xff]  ;;  %v322_v43 = vld [vmem:[#allocation10 + $0x10] sm:$0xff]  ;;  %v321_v44 = vld [vmem:[#allocation10 + $0x8] sm:$0xff]  ;;  %p669_p1 = pnand %p668_p0, %p662_p11 }
  0x48   :  { %489 = vmatpush3.bf16.msra.mxu0 %v554_v10  ;;  %509 = vmatpush3.msra.mxu1 %v334_v18  ;;  %v320_v45 = vld [vmem:[#allocation10] sm:$0xff]  ;;  %v434_v46 = vld [vmem:[%s821_s6] ss:$0 sm:$0xff] }
  0x49   :  { %490 = vmatprep.subr.bf16.mxu0 %v698_v0  ;;  %510 = vmatprep.subr.mxu1 %v698_v0  ;;  %v443_v53 = vld [vmem:[%s823_s8] ss:$0 sm:$0xff] }
  0x4a   :  { %511 = vmatpush3.msra.mxu1 %v333_v19 }
  0x4b   :  { %512 = vmatprep.subr.mxu1 %v698_v0 }
  0x4c   :  { %491 = vmatpush3.bf16.msra.mxu0 %v555_v11  ;;  %513 = vmatpush3.msra.mxu1 %v332_v20 }
  0x4d   :  { %492 = vmatprep.subr.bf16.mxu0 %v698_v0  ;;  %514 = vmatprep.subr.mxu1 %v698_v0 }
  0x4e   :  { %515 = vmatpush3.msra.mxu1 %v331_v21 }
  0x4f   :  { %516 = vmatprep.subr.mxu1 %v698_v0 }
  0x50   :  { %493 = vmatpush3.bf16.msra.mxu0 %v556_v12  ;;  %517 = vmatpush3.msra.mxu1 %v330_v22 }
  0x51   :  { %494 = vmatprep.subr.bf16.mxu0 %v698_v0  ;;  %518 = vmatprep.subr.mxu1 %v698_v0 }
  0x52   :  { %519 = vmatpush3.msra.mxu1 %v329_v23 }
  0x53   :  { %520 = vmatprep.subr.mxu1 %v698_v0 }
  0x54   :  { %495 = vmatpush3.bf16.msra.mxu0 %v557_v13  ;;  %521 = vmatpush3.msra.mxu1 %v328_v24 }
  0x55   :  { %496 = vmatprep.subr.bf16.mxu0 %v698_v0  ;;  %522 = vmatprep.subr.mxu1 %v698_v0 }
  0x56   :  { %523 = vmatpush3.msra.mxu1 %v327_v25 }
  0x57   :  { %524 = vmatprep.subr.mxu1 %v698_v0 }
  0x58   :  { %497 = vmatpush3.bf16.msra.mxu0 %v558_v14  ;;  %525 = vmatpush3.msra.mxu1 %v326_v26 }
  0x59   :  { %498 = vmatprep.subr.bf16.mxu0 %v698_v0  ;;  %526 = vmatprep.subr.mxu1 %v698_v0 }
  0x5a   :  { %527 = vmatpush3.msra.mxu1 %v325_v27 }
  0x5b   :  { %528 = vmatprep.subr.mxu1 %v698_v0 }
  0x5c   :  { %499 = vmatpush3.bf16.msra.mxu0 %v559_v15  ;;  %529 = vmatpush3.msra.mxu1 %v324_v28 }
  0x5d   :  { %500 = vmatprep.subr.bf16.mxu0 %v698_v0  ;;  %530 = vmatprep.subr.mxu1 %v698_v0 }
  0x5e   :  { %531 = vmatpush3.msra.mxu1 %v323_v29 }
  0x5f   :  { %532 = vmatprep.subr.mxu1 %v698_v0 }
  0x60   :  { %501 = vmatpush3.bf16.msra.mxu0 %v560_v16  ;;  %533 = vmatpush3.msra.mxu1 %v322_v43 }
  0x61   :  { %534 = vmatprep.subr.mxu1 %v698_v0 }
  0x62   :  { %535 = vmatpush3.msra.mxu1 %v321_v44 }
  0x63   :  { %536 = vmatprep.subr.mxu1 %v698_v0 }
  0x64   :  { %537 = vmatpush3.msra.mxu1 %v320_v45 }
 0x103   :  { %v144_v30 = vpop.f32.mrf.mxu0  ;;  %v192_v31 = vpop.f32.mrf.mxu1 }
 0x104   :  { %v193_v33 = vadd.f32 %v192_v31, %v144_v30 }
 0x105   :  { %v478_v34 = vpop.f32.mrf.mxu0  ;;  %v484_v35 = vpop.f32.mrf.mxu1 }
 0x106   :  { %v205_v36 = vadd.f32 %v433_v32, %v193_v33 }
 0x107   :  { %v147_v37 = vpop.f32.mrf.mxu0  ;;  %v195_v38 = vpop.f32.mrf.mxu1 }
 0x108   :  { %v206_v39 = vmax.f32 %v205_v36, 0.0 }
 0x109   :  { %v479_v40 = vpop.f32.mrf.mxu0  ;;  %v485_v41 = vpop.f32.mrf.mxu1 }
 0x10a   :  { %v207_v42 = vpack.c.bf16 %v206_v39, %v206_v39 }
 0x10c   :  { %503 = vmatmul.mubr.bf16.vlgmr.msra.gmra.mxu0 %v207_v42 }
 0x1cc   :  { %v313_v47 = vpop.f32.mrf.mxu0 }
 0x1cd   :  { %v314_v48 = vadd.f32 %v434_v46, %v313_v47 }
 0x1ce   :  { %v504_v49 = vpop.f32.mrf.mxu0 }
 0x1cf   :  { %v319_v50 = vmax.f32 %v314_v48, 0.0 }
 0x1d0   :  { %v316_v51 = vpop.f32.mrf.mxu0 }
 0x1d1   :  { %539 = vmatmul.mubr.f32.vlgmr.msra.gmra.mxu1 %v319_v50 }
 0x1d2   :  { %v505_v52 = vpop.f32.mrf.mxu0 }
 0x291   :  { %v409_v54 = vpop.f32.mrf.mxu1 }
 0x292   :  { %v410_v55 = vadd.f32 %v443_v53, %v409_v54 }
 0x293   :  { %v540_v56 = vpop.f32.mrf.mxu1 }
 0x294   :  { %413 = vst [vmem:[#allocation11] sm:$0x3] %v410_v55 }
 0x295   :  { %672 = shalt.err (!%p669_p1)
}
 0x296   :  { %423 = dma.vmem_to_hbm [thread:$0]  %s421_s19, 32, %s824_s9, [#allocation4]  }
 0x297   :  { %687 = dma.done.wait [#allocation4], 32  }
 0x298   :  { %688 = vsyncadd [#allocation4], 4294967264 }
 0x299   :  { %427 = vsyncpa [#allocation3], 1 }
 0x29a   :  { %428 = vsyncpa [#allocation6], 1 }
 0x29b   :  { %429 = vsyncpa [#allocation9], 1 }
 0x29c   :  { %430 = vsyncpa [#allocation4], 1 }

</bundles_post_ra>
